<compile_context>
chip_gen: v7x
topology: tpu7x:2x2x1
jax: 0.10.0
libtpu: 0.0.40
codegen_flags: <defaults>
</compile_context>

<pallas_src>
import functools
from typing import NamedTuple

import numpy as np
import jax
import jax.numpy as jnp
from jax import lax
from jax.experimental import pallas as pl
from jax.experimental.pallas import tpu as pltpu

LANE = 128


def _round_up(x, m):
    return (x + m - 1) // m * m


def _pad2d(a, rows, cols, dtype):
    r, c = a.shape
    out = jnp.zeros((rows, cols), dtype)
    return out.at[:r, :c].set(a.astype(dtype))


def _pick_tile(n_pad):
    # Largest (tm = tk) tile that divides n_pad while keeping >= 2 row tiles,
    # so v7x's two TensorCores both get row tiles.  adj is int8, so even a
    # 1024x1024 double-buffered tile stays far below the 48 MiB VMEM budget.
    for t in (1024, 512, 256):
        if n_pad % t == 0 and n_pad // t >= 2:
            return t
    return LANE


class Graph(NamedTuple):
    adj_i8: jax.Array    # (n_pad, n_pad) int8, exact 0/1 entries of A + I
    d_inv: jax.Array     # (n_pad, 1) f32 D^-1/2 (zero on padded rows)
    nz_cols: jax.Array   # (n_row_tiles, max_nnz) int32 nonzero column-tile ids
    nz_cnt: jax.Array    # (n_row_tiles,) int32 valid entries per row tile
    tm: int
    tk: int
    num_nodes: int


def prepare_graph(edge_index, num_nodes):
    """One-off per-graph preprocessing (outside the per-forward hot path).

    Builds the padded int8 (A+I), D^-1/2, and the block-sparsity metadata the
    kernels consume via scalar prefetch.  Assumes a simple graph (no duplicate
    edges); edges are symmetrized like the undirected Planetoid datasets.
    """
    src, dst = edge_index[0], edge_index[1]
    a = jnp.zeros((num_nodes, num_nodes), jnp.float32)
    a = a.at[src, dst].set(1.0)
    a = a.at[dst, src].set(1.0)                            # undirected
    a = jnp.maximum(a, jnp.eye(num_nodes, dtype=jnp.float32))  # self loops, 0/1
    deg = jnp.sum(a, axis=1)
    d_inv_sqrt = jnp.where(deg > 0, lax.rsqrt(deg), 0.0)

    n_pad = _round_up(num_nodes, LANE)
    tm = tk = _pick_tile(n_pad)

    adj_i8 = _pad2d(a, n_pad, n_pad, jnp.int8)
    d_inv = _pad2d(d_inv_sqrt[:, None], n_pad, 1, jnp.float32)

    # Block-sparsity metadata: per row tile, the list of nonzero column tiles
    # (padded by repeating the last valid id so the pipelined DMA re-targets
    # the same, already-resident block on the skipped steps).
    n_rt, n_kt = n_pad // tm, n_pad // tk
    blk = np.asarray(adj_i8).reshape(n_rt, tm, n_kt, tk).any(axis=(1, 3))
    counts = blk.sum(axis=1).astype(np.int32)
    max_nnz = int(max(int(counts.max()), 1))
    nz_cols = np.zeros((n_rt, max_nnz), np.int32)
    for i in range(n_rt):
        c = np.nonzero(blk[i])[0].astype(np.int32)
        if c.size == 0:
            c = np.zeros((1,), np.int32)
        nz_cols[i, :c.size] = c
        nz_cols[i, c.size:] = c[-1]

    return Graph(adj_i8=adj_i8, d_inv=d_inv,
                 nz_cols=jnp.asarray(nz_cols), nz_cnt=jnp.asarray(counts),
                 tm=tm, tk=tk, num_nodes=num_nodes)


def gcn_layer_kernel(cols_ref, cnt_ref, adj_ref, feat_ref, dinv_ref, b_ref,
                     out_ref, acc_ref, *, activation, num_valid, tk):
    """out_rowtile = act(d^-1/2 * [(A+I) @ feat] + b); feat is pre-scaled by d^-1/2.

    Grid = (row tiles, compressed nonzero column tiles).  acc accumulates
    (A+I)_tile @ feat_tile in f32; bias + activation run once per row tile.
    """
    i = pl.program_id(0)
    k = pl.program_id(1)

    @pl.when(k == 0)
    def _():
        acc_ref[...] = jnp.zeros_like(acc_ref)

    @pl.when(k < cnt_ref[i])
    def _():
        # Exact upcast of the 0/1 int8 adjacency tile (via f32: well-supported
        # converts); the VPU cast hides under the adj DMA.
        adj = adj_ref[...].astype(jnp.float32).astype(jnp.bfloat16)
        col = cols_ref[i, k]
        start = pl.multiple_of(col * tk, tk)
        feat = feat_ref[pl.ds(start, tk), :]       # slice of VMEM-resident feat
        acc_ref[...] += jnp.dot(adj, feat, preferred_element_type=jnp.float32)

    @pl.when(k == pl.num_programs(1) - 1)
    def _():
        z = acc_ref[...] * dinv_ref[...] + b_ref[...]
        if activation == "relu":
            out_ref[...] = jnp.maximum(z, 0.0).astype(out_ref.dtype)
        else:  # masked log_softmax over the class (lane) axis
            lane = lax.broadcasted_iota(jnp.int32, z.shape, 1)
            z = jnp.where(lane < num_valid, z, -1e30)
            m = jnp.max(z, axis=1, keepdims=True)
            lse = m + jnp.log(jnp.sum(jnp.exp(z - m), axis=1, keepdims=True))
            out_ref[...] = (z - lse).astype(out_ref.dtype)


def _gcn_layer(g, feat, b, *, activation, num_valid, out_dtype):
    n_pad = g.adj_i8.shape[0]
    o_pad = feat.shape[1]
    tm, tk = g.tm, g.tk
    max_nnz = g.nz_cols.shape[1]
    kern = functools.partial(gcn_layer_kernel, activation=activation,
                             num_valid=num_valid, tk=tk)
    return pl.pallas_call(
        kern,
        out_shape=jax.ShapeDtypeStruct((n_pad, o_pad), out_dtype),
        grid_spec=pltpu.PrefetchScalarGridSpec(
            num_scalar_prefetch=2,
            grid=(n_pad // tm, max_nnz),
            in_specs=[
                # adj int8 tile, streamed; the column-tile id comes from the
                # prefetched nonzero-block list (data-dependent index_map).
                pl.BlockSpec((tm, tk), lambda i, k, cols, cnt: (i, cols[i, k])),
                # feat: VMEM-resident (constant index), sliced in-kernel.
                pl.BlockSpec((n_pad, o_pad), lambda i, k, cols, cnt: (0, 0)),
                # d^-1/2 row tile.
                pl.BlockSpec((tm, 1), lambda i, k, cols, cnt: (i, 0)),
                # bias (resident).
                pl.BlockSpec((1, o_pad), lambda i, k, cols, cnt: (0, 0)),
            ],
            out_specs=pl.BlockSpec((tm, o_pad), lambda i, k, cols, cnt: (i, 0)),
            scratch_shapes=[pltpu.VMEM((tm, o_pad), jnp.float32)],
        ),
        compiler_params=pltpu.CompilerParams(
            dimension_semantics=("parallel", "arbitrary"),
            # Explicit limit: v5e's scoped default is only 16 MiB; <= 48 MiB
            # keeps the same config inside v7x's 64 MiB physical VMEM.
            vmem_limit_bytes=48 * 1024 * 1024,
        ),
    )(g.nz_cols, g.nz_cnt, g.adj_i8, feat, g.d_inv, b)


def gcn_forward(g, x, w1, b1, w2, b2):
    """conv1 -> relu -> dropout(eval, identity) -> conv2 -> log_softmax."""
    n = g.num_nodes
    n_pad = g.adj_i8.shape[0]
    hidden = w1.shape[1]
    f_out = w2.shape[1]
    hid_p = _round_up(hidden, LANE)
    out_p = _round_up(f_out, LANE)

    # Layer 1: hoisted small GEMM X @ W1 (tiny XLA op), rows scaled by d^-1/2.
    feat1 = _pad2d(x @ w1, n_pad, hid_p, jnp.float32) * g.d_inv
    h = _gcn_layer(g, feat1.astype(jnp.bfloat16),
                   _pad2d(b1, 1, hid_p, jnp.float32),
                   activation="relu", num_valid=hidden, out_dtype=jnp.bfloat16)

    # TODO(synk): training-mode dropout (pltpu.prng_random_bits mask); eval = identity.

    # Layer 2: hoisted GEMM H @ W2 (f32), rows scaled by d^-1/2.
    w2_p = _pad2d(w2, hid_p, out_p, jnp.float32)
    feat2 = (h.astype(jnp.float32) @ w2_p) * g.d_inv
    z = _gcn_layer(g, feat2.astype(jnp.bfloat16),
                   _pad2d(b2, 1, out_p, jnp.float32),
                   activation="log_softmax", num_valid=f_out,
                   out_dtype=jnp.float32)

    return z[:n, :f_out]


def gcn_reference(adj_hat, x, w1, b1, w2, b2):
    """Plain-JAX f32 reference of the same forward pass."""
    h = jnp.maximum(adj_hat @ (x @ w1) + b1, 0.0)
    z = adj_hat @ (h @ w2) + b2
    return jax.nn.log_softmax(z, axis=1)


if __name__ == "__main__":
    # Small synthetic graph: N nodes (pads to 384 -> 3x3 block grid, exercises
    # multi-tile + block-sparse paths), input_dim features, hidden, classes.
    N, input_dim, hidden_dim, output_dim = 300, 16, 32, 8

    key = jax.random.PRNGKey(0)
    kx, kw1, kb1, kw2, kb2, ke = jax.random.split(key, 6)

    # Node features (data.x)
    x = jax.random.normal(kx, (N, input_dim), dtype=jnp.float32)

    # Edge index (data.edge_index): ring graph plus a few random chords.
    ring_src = jnp.arange(N, dtype=jnp.int32)
    ring_dst = (ring_src + 1) % N
    extra_src = jax.random.randint(ke, (32,), 0, N, dtype=jnp.int32)
    extra_dst = (extra_src + 17) % N
    edge_index = jnp.stack(
        [jnp.concatenate([ring_src, extra_src]),
         jnp.concatenate([ring_dst, extra_dst])], axis=0)

    g = prepare_graph(edge_index, N)   # one-off per graph

    # Glorot-style weights; small nonzero biases to exercise the epilogue.
    w1 = jax.random.normal(kw1, (input_dim, hidden_dim), jnp.float32) * (
        1.0 / jnp.sqrt(input_dim))
    b1 = 0.1 * jax.random.normal(kb1, (1, hidden_dim), jnp.float32)
    w2 = jax.random.normal(kw2, (hidden_dim, output_dim), jnp.float32) * (
        1.0 / jnp.sqrt(hidden_dim))
    b2 = 0.1 * jax.random.normal(kb2, (1, output_dim), jnp.float32)

    out = gcn_forward(g, x, w1, b1, w2, b2)
    out = jax.block_until_ready(out)

    # Sanity checks:
    assert out.shape == (N, output_dim)
    # 1) rows of log_softmax sum (in prob space) to ~1 (f32 in-kernel)
    probs_sum = jnp.sum(jnp.exp(out), axis=1)
    assert bool(jnp.all(jnp.abs(probs_sum - 1.0) < 1e-3))
    # 2) close to the plain-JAX f32 reference built from the exact same adj_hat
    #    (bf16 feature operands -> loose tolerance)
    a_dense = g.adj_i8[:N, :N].astype(jnp.float32)
    d = g.d_inv[:N]
    adj_hat = a_dense * d * d.T
    ref = gcn_reference(adj_hat, x, w1, b1, w2, b2)
    assert bool(jnp.max(jnp.abs(out - ref)) < 0.15)

    print("KERNEL_OK")
</pallas_src>

<mosaic_0001>
module attributes {stable_mosaic.version = 11 : i64} {
  func.func @gcn_layer_kernel(%arg0: i32, %arg1: i32, %arg2: memref<3x3xi32, #tpu.memory_space<smem>>, %arg3: memref<3xi32, #tpu.memory_space<smem>>, %arg4: memref<128x128xi8, #tpu.memory_space<vmem>>, %arg5: memref<384x128xbf16, #tpu.memory_space<vmem>>, %arg6: memref<128x1xf32, #tpu.memory_space<vmem>>, %arg7: memref<1x128xf32, #tpu.memory_space<vmem>>, %arg8: memref<128x128xbf16, #tpu.memory_space<vmem>>, %arg9: memref<128x128xf32, #tpu.memory_space<vmem>>) attributes {dimension_semantics = [#tpu.dimension_semantics<parallel>, #tpu.dimension_semantics<arbitrary>], iteration_bounds = array<i64: 3, 3>, scalar_prefetch = 2 : i64, scratch_operands = 1 : i64, tpu.core_type = #tpu.core_type<tc>, window_params = [{transform_indices = @transform_0, window_bounds = array<i64: 128, 128>}, {pipeline_mode = #tpu.pipeline_mode<synchronous>, transform_indices = @transform_1, window_bounds = array<i64: 384, 128>}, {transform_indices = @transform_2, window_bounds = array<i64: 128, 1>}, {pipeline_mode = #tpu.pipeline_mode<synchronous>, transform_indices = @transform_3, window_bounds = array<i64: 1, 128>}, {transform_indices = @transform_4, window_bounds = array<i64: 128, 128>}]} {
    %c0_i32 = arith.constant 0 : i32
    %0 = arith.cmpi eq, %arg1, %c0_i32 : i32
    %1 = arith.extui %0 : i1 to i32
    %c0_i32_0 = arith.constant 0 : i32
    %2 = arith.cmpi ne, %1, %c0_i32_0 : i32
    scf.if %2 {
      %cst = arith.constant 0.000000e+00 : f32
      %11 = vector.broadcast %cst : f32 to vector<128x128xf32>
      %c0 = arith.constant 0 : index
      %c0_3 = arith.constant 0 : index
      %12 = vector.load %arg9[%c0, %c0_3] : memref<128x128xf32, #tpu.memory_space<vmem>>, vector<128x128xf32>
      tpu.vector_store %arg9[%c0, %c0_3], %11 {strides = array<i32>} : memref<128x128xf32, #tpu.memory_space<vmem>>, vector<128x128xf32>,
    } else {
    }
    %3 = arith.index_cast %arg0 : i32 to index
    %4 = memref.load %arg3[%3] : memref<3xi32, #tpu.memory_space<smem>>
    %5 = arith.cmpi slt, %arg1, %4 : i32
    %6 = arith.extui %5 : i1 to i32
    %c0_i32_1 = arith.constant 0 : i32
    %7 = arith.cmpi ne, %6, %c0_i32_1 : i32
    scf.if %7 {
      %c0 = arith.constant 0 : index
      %c0_3 = arith.constant 0 : index
      %11 = vector.load %arg4[%c0, %c0_3] : memref<128x128xi8, #tpu.memory_space<vmem>>, vector<128x128xi8>
      %12 = arith.sitofp %11 : vector<128x128xi8> to vector<128x128xf32>
      %13 = arith.truncf %12 : vector<128x128xf32> to vector<128x128xbf16>
      %14 = arith.index_cast %arg0 : i32 to index
      %15 = arith.index_cast %arg1 : i32 to index
      %16 = memref.load %arg2[%14, %15] : memref<3x3xi32, #tpu.memory_space<smem>>
      %c128_i32 = arith.constant 128 : i32
      %17 = arith.muli %16, %c128_i32 : i32
      %18 = tpu.assume_multiple %17, 128 : i32
      %19 = arith.index_cast %18 : i32 to index
      %c0_4 = arith.constant 0 : index
      %20 = vector.load %arg5[%19, %c0_4] : memref<384x128xbf16, #tpu.memory_space<vmem>>, vector<128x128xbf16>
      %c0_5 = arith.constant 0 : index
      %c0_6 = arith.constant 0 : index
      %21 = vector.load %arg9[%c0_5, %c0_6] : memref<128x128xf32, #tpu.memory_space<vmem>>, vector<128x128xf32>
      %cst = arith.constant dense<0.000000e+00> : vector<128x128xf32>
      %22 = tpu.matmul %13, %20, %cst {dimension_numbers = #tpu.dot_dimension_numbers<[1], [0], [0], [1], [0, 0, 1, 1], [], []>} : vector<128x128xbf16>, vector<128x128xbf16>, vector<128x128xf32> -> vector<128x128xf32>
      %23 = arith.addf %21, %22 : vector<128x128xf32>
      %c0_7 = arith.constant 0 : index
      %c0_8 = arith.constant 0 : index
      %24 = vector.load %arg9[%c0_7, %c0_8] : memref<128x128xf32, #tpu.memory_space<vmem>>, vector<128x128xf32>
      tpu.vector_store %arg9[%c0_7, %c0_8], %23 {strides = array<i32>} : memref<128x128xf32, #tpu.memory_space<vmem>>, vector<128x128xf32>,
    } else {
    }
    %c2_i32 = arith.constant 2 : i32
    %8 = arith.cmpi eq, %arg1, %c2_i32 : i32
    %9 = arith.extui %8 : i1 to i32
    %c0_i32_2 = arith.constant 0 : i32
    %10 = arith.cmpi ne, %9, %c0_i32_2 : i32
    scf.if %10 {
      %c0 = arith.constant 0 : index
      %c0_3 = arith.constant 0 : index
      %11 = vector.load %arg9[%c0, %c0_3] : memref<128x128xf32, #tpu.memory_space<vmem>>, vector<128x128xf32>
      %c0_4 = arith.constant 0 : index
      %c0_5 = arith.constant 0 : index
      %12 = vector.load %arg6[%c0_4, %c0_5] : memref<128x1xf32, #tpu.memory_space<vmem>>, vector<128x1xf32>
      %13 = vector.broadcast %12 : vector<128x1xf32> to vector<128x128xf32>
      %14 = arith.mulf %11, %13 : vector<128x128xf32>
      %c0_6 = arith.constant 0 : index
      %c0_7 = arith.constant 0 : index
      %15 = vector.load %arg7[%c0_6, %c0_7] : memref<1x128xf32, #tpu.memory_space<vmem>>, vector<1x128xf32>
      %16 = vector.broadcast %15 : vector<1x128xf32> to vector<128x128xf32>
      %17 = arith.addf %14, %16 : vector<128x128xf32>
      %cst = arith.constant 0.000000e+00 : f32
      %18 = vector.broadcast %cst : f32 to vector<128x128xf32>
      %19 = arith.maximumf %17, %18 : vector<128x128xf32>
      %20 = arith.truncf %19 : vector<128x128xf32> to vector<128x128xbf16>
      %c0_8 = arith.constant 0 : index
      %c0_9 = arith.constant 0 : index
      %21 = vector.load %arg8[%c0_8, %c0_9] : memref<128x128xbf16, #tpu.memory_space<vmem>>, vector<128x128xbf16>
      tpu.vector_store %arg8[%c0_8, %c0_9], %20 {strides = array<i32>} : memref<128x128xbf16, #tpu.memory_space<vmem>>, vector<128x128xbf16>,
    } else {
    }
    return
  }
  func.func @transform_0(%arg0: i32, %arg1: i32, %arg2: memref<3x3xi32, #tpu.memory_space<smem>>, %arg3: memref<3xi32, #tpu.memory_space<smem>>) -> (i32, i32) {
    %0 = arith.index_cast %arg0 : i32 to index
    %1 = arith.index_cast %arg1 : i32 to index
    %2 = memref.load %arg2[%0, %1] : memref<3x3xi32, #tpu.memory_space<smem>>
    %c0_i32 = arith.constant 0 : i32
    return %arg0, %2 : i32, i32
  }
  func.func @transform_1(%arg0: i32, %arg1: i32, %arg2: memref<3x3xi32, #tpu.memory_space<smem>>, %arg3: memref<3xi32, #tpu.memory_space<smem>>) -> (i32, i32) {
    %c0_i32 = arith.constant 0 : i32
    %c0_i32_0 = arith.constant 0 : i32
    %c0_i32_1 = arith.constant 0 : i32
    return %c0_i32, %c0_i32_0 : i32, i32
  }
  func.func @transform_2(%arg0: i32, %arg1: i32, %arg2: memref<3x3xi32, #tpu.memory_space<smem>>, %arg3: memref<3xi32, #tpu.memory_space<smem>>) -> (i32, i32) {
    %c0_i32 = arith.constant 0 : i32
    %c0_i32_0 = arith.constant 0 : i32
    return %arg0, %c0_i32 : i32, i32
  }
  func.func @transform_3(%arg0: i32, %arg1: i32, %arg2: memref<3x3xi32, #tpu.memory_space<smem>>, %arg3: memref<3xi32, #tpu.memory_space<smem>>) -> (i32, i32) {
    %c0_i32 = arith.constant 0 : i32
    %c0_i32_0 = arith.constant 0 : i32
    %c0_i32_1 = arith.constant 0 : i32
    return %c0_i32, %c0_i32_0 : i32, i32
  }
  func.func @transform_4(%arg0: i32, %arg1: i32, %arg2: memref<3x3xi32, #tpu.memory_space<smem>>, %arg3: memref<3xi32, #tpu.memory_space<smem>>) -> (i32, i32) {
    %c0_i32 = arith.constant 0 : i32
    %c0_i32_0 = arith.constant 0 : i32
    return %arg0, %c0_i32 : i32, i32
  }
}

</mosaic_0001>

<bundles_post_ra>
// kernel: tpu_custom_call.1
= control target key start
LH: loop header
LB: loop body
LE: loop exit
PB: predicated region body
PF: predicated region fallthrough
CT: control target
= control target key end

     0   :  { %s1795_s0 = inlined_call_operand.vmem [shape: s32[3,3], index: 0, kind: input, shape index: {}]   ;;  %s1796_s2 = inlined_call_operand.vmem [shape: s8[384,384], index: 2, kind: input, shape index: {}]   ;;  %s1797_s3 = inlined_call_operand.hbm [shape: bf16[384,128], index: 3, kind: input, shape index: {}]   ;;  %s1798_s4 = inlined_call_operand.vmem [shape: f32[384,1], index: 4, kind: input, shape index: {}]   ;;  %s1799_s5 = inlined_call_operand.vmem [shape: f32[1,128], index: 5, kind: input, shape index: {}]   ;;  %s1800_s6 = inlined_call_operand.hbm [shape: bf16[384,128], index: 6, kind: output, shape index: {}]   ;;  %s1801_s1 = inlined_call_operand.vmem [shape: s32[3], index: 1, kind: input, shape index: {}]  }
   0x1   :  { %s11_s23 = sshll.u32 %s1795_s0, 4  ;;  %s15_s26 = sshll.u32 %s1801_s1, 4  ;;  %s12_s23 = int_to_ptr.vmem [resolvable:$true] %s11_s23  ;;  %s16_s26 = int_to_ptr.vmem [resolvable:$true] %s15_s26 }
   0x2   :  { %s1273_s27 = scalar_lea.vmem %s12_s23, 64  ;;  %p1278_p1 = scmp.lt.s32.totalorder %s12_s23, %s12_s23 }
   0x3   :  { %p1274_p0 = scmp.ne.s32.totalorder %s12_s23, %s1273_s27  ;;  %p1279_p2 = scmp.lt.s32.totalorder %s1273_s27, %s1273_s27 }
   0x5   :  { %p1280_p3 = por %p1279_p2, %p1278_p1 }
   0x7   :  { %p1281_p4 = pnand %p1280_p3, %p1274_p0 }
   0x9   :  { %1284 = shalt.err (!%p1281_p4)  }
   0xa   :  { %s1443_s28 = smov [#allocation4]   ;;  %s1285_s29 = scalar_lea.vmem %s16_s26, 16 }
   0xb   :  { %14 = dma.vmem_to_smem %s12_s23, 64, %s1443_s28, [#allocation3] }
   0xc   :  { %p1286_p5 = scmp.ne.s32.totalorder %s16_s26, %s1285_s29  ;;  %p1290_p6 = scmp.lt.s32.totalorder %s16_s26, %s16_s26 }
   0xd   :  { %p1291_p7 = scmp.lt.s32.totalorder %s1285_s29, %s1285_s29 }
   0xf   :  { %p1292_p8 = por %p1291_p7, %p1290_p6 }
  0x11   :  { %p1293_p9 = pnand %p1292_p8, %p1286_p5 }
  0x13   :  { %1296 = shalt.err (!%p1293_p9)  }
  0x14   :  { %s1444_s0 = smov [#allocation5]  }
  0x15   :  { %18 = dma.vmem_to_smem %s16_s26, 16, %s1444_s0, [#allocation3] }
  0x16   :  { %1393 = dma.done.wait [#allocation3], 80 }
  0x17   :  { %1394 = vsyncadd [#allocation3], 4294967216 }
  0x18   :  { %20 = sfence }
  0x19   :  { %21 = vsyncpa [#allocation8], 0 }
  0x1a   :  { %22 = vsyncpa [#allocation9], 0 }
  0x1b   :  { %24 = vsyncpa [#allocation9 + $0x1], 0  ;;  %s1494_s1 = smov 0   ;;  %s1496_s30 = smov 0  }
  0x1c   :  { %s1498_s7 = smov 0   ;;  %s1500_s8 = smov 0  }
  0x1d   :  { %s1502_s9 = smov 0   ;;  %s1504_s10 = smov 0  }
  0x1e   :  { %s1506_s11 = smov 0   ;;  %s1508_s12 = smov 0  }
  0x1f   :  { %s1510_s13 = smov 0   ;;  %s1512_s14 = smov 0  }
  0x20 LB: > { %1811 = sst [smem:[#allocation14_spill]] %s1413_s7  ;;  %s974_s15 = sadd.s32 4294967295, %s1441_s14   ;;  %s1441_s14 = sphi %s1512_s14, %s30_s14   ;;  %s1437_s13 = sphi %s1510_s13, %s1842_s13   ;;  %s1433_s12 = sphi %s1508_s12, %s1835_s12   ;;  %s1429_s11 = sphi %s1506_s11, %s1841_s11   ;;  %s1425_s10 = sphi %s1504_s10, %s1834_s10   ;;  %s1421_s9 = sphi %s1502_s9, %s1840_s9   ;;  %s1417_s8 = sphi %s1500_s8, %s1839_s8   ;;  %s1413_s7 = sphi %s1498_s7, %s1832_s7   ;;  %s1409_s30 = sphi %s1496_s30, %s1838_s30   ;;  %s1405_s1 = sphi %s1494_s1, %s1837_s1  }
  0x21   : > { %1812 = sst [smem:[#allocation15_spill]] %s1433_s12  ;;  %s39_s17 = sadd.s32 1, %s1433_s12 }
  0x22   : > { %s42_s18 = sadd.s32 1, %s1437_s13  ;;  %p40_p10 = scmp.ge.s32.totalorder %s39_s17, 3 }
  0x23   : > { %s46_s19 = sshra.s32 %s1433_s12, 7  ;;  %s51_s21 = sand.u32 127, %s1433_s12 }
  0x24   : > { %s48_s20 = sadd.s32 %s1437_s13, %s46_s19  ;;  %s1844_s17 = smov (%p40_p10, %s39_s17), 0 }
  0x25   : > { %1813 = sst [smem:[#allocation16_spill]] %s1844_s17  ;;  %s1846_s18 = smov (!%p40_p10, %s42_s18), %s1437_s13 }
  0x26   : > { %s976_s22 = sshll.u32 %s48_s20, 7  ;;  %s54_s23 = sshra.s32 %s1844_s17, 7 }
  0x27   : > { %p44_p11 = scmp.ge.s32.totalorder %s1846_s18, 3  ;;  %s1555_s24 = sadd.s32 %s976_s22, %s51_s21 }
  0x28   : > { %s53_s25 = sld [smem:[#allocation4 + %s1555_s24]]  ;;  %s59_s26 = sand.u32 127, %s1844_s17 }
  0x29   : > { %s1848_s18 = smov (%p44_p11, %s1846_s18), 0  ;;  %s67_s27 = sadd.s32 1, %s1421_s9 }
  0x2a   : > { %1814 = sst [smem:[#allocation17_spill]] %s1848_s18  ;;  %p74_p12 = scmp.ne.s32.totalorder %s1421_s9, %s1417_s8 }
  0x2b   : > { %s56_s28 = sadd.s32 %s54_s23, %s1848_s18  ;;  %s62_s29 = ssub.s32 %s1437_s13, %s1848_s18 }
  0x2c   : > { %s977_s0 = sshll.u32 %s56_s28, 7  ;;  %p75_p13 = scmp.eq.s32.totalorder %s1441_s14, 0 }
  0x2d   : > { %s60_s19 = sadd.s32 %s977_s0, %s59_s26  ;;  %p159_p0 = scmp.eq.s32.totalorder %s62_s29, 0 }
  0x2e   : > { %s61_s20 = sld [smem:[#allocation4 + %s60_s19]]  ;;  %p1568_p1 = por %p75_p13, %p74_p12 }
  0x2f   : > { %s161_s22 = sadd.s32 1, %s1413_s7  ;;  %p171_p2 = scmp.ne.s32.totalorder %s1413_s7, %s1409_s30 }
  0x30   : > { %s1815_s21 = scalar_select %p1568_p1, 1, 0 }
  0x31   : > { %s1576_s16 = scalar_select %p159_p0, %s1413_s7, %s161_s22  }
  0x32   : > { %p172_p3 = scmp.eq.s32.totalorder %s974_s15, 8  ;;  %p177_p4 = scmp.ne.s32.totalorder %s1409_s30, %s1405_s1 }
  0x33   : > { %1816 = sst [smem:[#allocation18_spill]] %s1576_s16  ;;  %s1817_s23 = sadd.s32 4294967294, %s1441_s14  }
  0x34   : > { %p178_p5 = scmp.eq.s32.totalorder %s1817_s23, 8  ;;  %p978_p6 = scmp.ge.s32.totalorder %s1441_s14, 1 }
  0x35   : > { %p1585_p7 = por %p172_p3, %p171_p2  ;;  %p185_p8 = scmp.lt.s32.totalorder %s1441_s14, 10 }
  0x36   : > { %s63_s28 = ssub.s32 %s53_s25, %s61_s20  ;;  %p1590_p9 = por %p178_p5, %p177_p4 }
  0x37   : > { %s1818_s26 = scalar_select %p1585_p7, 1, 0 }
  0x38   : > { %s1819_s0 = scalar_select %p1590_p9, 1, 0 }
  0x39   : > { %s64_s19 = sor.u32 %s63_s28, %s62_s29  ;;  %p1594_p10 = pnand %p978_p6, %p185_p8 }
  0x3a   : > { %1820 = sst [smem:[#allocation19_spill]] %s1819_s0  ;;  %p65_p11 = scmp.eq.s32.totalorder %s64_s19, 0 }
  0x3b   : > { %s1821_s22 = scalar_select %p1594_p10, 1, 0 }
  0x3c   : > { %p1163_p12 = pneg %p1594_p10  ;;  %p1602_p13 = scmp.eq.s32.totalorder %s974_s15, 0 }
  0x3d   : > { %s1607_s25 = scalar_select %p65_p11, %s1421_s9, %s67_s27  }
  0x3e   : > { %s1822_s23 = scalar_select %p1602_p13, 1, 0 }
  0x3f   : > { %1823 = sst [smem:[#allocation20_spill]] %s1607_s25  ;;  %p1611_p0 = pnand %p1602_p13, %p1163_p12 }
  0x40   : > { %s1445_s29 = smov [#allocation7]   ;;  %s1297_s17 = scalar_lea.hbm %s1797_s3, 3072 }
  0x41   : > { %s197_s28 = sshll.u32 %s1445_s29, 4  ;;  %p1298_p2 = scmp.ne.s32.totalorder %s1797_s3, %s1297_s17  ;;  %s198_s28 = int_to_ptr.vmem [resolvable:$true] %s197_s28 }
  0x42   : > { %p1299_p3 = pneg %p1611_p0  ;;  %p1304_p6 = scmp.lt.u32.totalorder %s1297_s17, %s1797_s3 }
  0x44   : > { %p1300_p4 = pnand %p1299_p3, %p1298_p2 }
  0x46   : > { %p1301_p5 = pneg %p1300_p4 }
  0x48   : > { %p1306_p8 = pnand %p1304_p6, %p1301_p5 }
  0x4a   : > { %1309 = shalt.err (!%p1306_p8)
}
  0x4b   : > { %s1310_s29 = scalar_lea.vmem %s198_s28, 3072  ;;  %p1318_p7 = scmp.lt.s32.totalorder %s198_s28, %s198_s28 }
  0x4c   : > { %p1311_p11 = scmp.ne.s32.totalorder %s198_s28, %s1310_s29  ;;  %p1319_p13 = scmp.lt.s32.totalorder %s1310_s29, %s1310_s29 }
  0x4e   : > { %p1313_p12 = pnand %p1311_p11, %p1299_p3  ;;  %p1320_p10 = por %p1319_p13, %p1318_p7 }
  0x50   : > { %p1314_p9 = pneg %p1313_p12 }
  0x52   : > { %p1321_p1 = pnand %p1320_p10, %p1314_p9 }
  0x54   : > { %1324 = shalt.err (!%p1321_p1)
}
  0x55   : > { %s1446_s12 = smov 64   ;;  %s1447_s18 = smov 4  }
  0x56   : > { %1166 = dma.hbm_to_vmem [thread:$0]  (!%p1611_p0), %s1797_s3, 3072, %s198_s28, [#allocation8], %s1446_s12, %s1446_s12, %s1447_s18  }
  0x57   : > { %p980_p2 = scmp.ge.s32.totalorder %s1441_s14, 9 }
  0x58   : > { %p1825_p4 = scmp.ne.s32.totalorder (!%p980_p2), %s1815_s21, 0 }
  0x59   : > { %210 = sbr.rel (%p980_p2) target bundleno = 108 (0x6c), region = 24 }
  0x60   : > { %213 = sbr.rel (!%p1825_p4) target bundleno = 108 (0x6c), region = 28  ;;  %s225_s17 = sld [smem:[#allocation4 + %s1555_s24]] (%p1825_p4) }
  0x61   : > { %s215_s25 = sand.u32 (%p1825_p4), 1, %s1421_s9   ;;  %s1156_s27 = smul.u32 (%p1825_p4), 12, %s1437_s13 }
  0x62   : > { %s981_s29 = sshll.u32 (%p1825_p4), %s215_s25, 5 }
  0x63   : > { %s217_s28 = scalar_lea.vmem (%p1825_p4), [#allocation6], %s981_s29 }
  0x66   : > { %s228_s16 = sadd.s32 (%p1825_p4), %s1156_s27, %s225_s17 }
  0x67   : > { %s985_s7 = sshll.u32 %s228_s16, 3 }
  0x68   : > { %s230_s19 = scalar_lea.vmem %s1796_s2, %s985_s7 }
  0x69   : > { %v264_v0 = vld [vmem:[%s230_s19] sm:$0xff]  ;;  %v266_v1 = vld [vmem:[%s230_s19 + $0x18] sm:$0xff]  ;;  %v268_v2 = vld [vmem:[%s230_s19 + $0x30] sm:$0xff] }
  0x6a   : > { %265 = vst [vmem:[%s217_s28] sm:$0xff] %v264_v0  ;;  %267 = vst [vmem:[%s217_s28 + $0x8] sm:$0xff] %v266_v1  ;;  %v270_v3 = vld [vmem:[%s230_s19 + $0x48] sm:$0xff] }
  0x6b   : > { %269 = vst [vmem:[%s217_s28 + $0x10] sm:$0xff] %v268_v2  ;;  %271 = vst [vmem:[%s217_s28 + $0x18] sm:$0xff] %v270_v3 }
  0x6c PF: > { %p1826_p1 = scmp.ne.s32.totalorder %s1821_s22, 0 }
  0x6d   : > { %s292_s16 = sand.u32 (!%p1826_p1), 1, %s1417_s8   ;;  %p1827_p7 = scmp.ne.s32.totalorder (!%p1826_p1), %s1822_s23, 0 }
  0x6e   : > { %289 = sbr.rel (%p1826_p1) target bundleno = 604 (0x25c), region = 70  ;;  %s987_s24 = sshll.u32 (!%p1826_p1), %s292_s16, 5 }
  0x6f   : > { %s1643_s21 = scalar_lea.vmem (!%p1826_p1), [#allocation6], %s987_s24 }
  0x75   : > { %1396 = dma.done.wait (%p1827_p7), [#allocation8], 3072  }
  0x76   : > { %1398 = vsyncadd (%p1827_p7), [#allocation8], 4294964224  ;;  %s323_s7 = sand.u32 1, %s1409_s30   ;;  %s990_s0 = sshll.u32 %s1429_s11, 4 }
  0x77   : > { %s989_s12 = sshll.u32 %s323_s7, 6  ;;  %p336_p9 = scmp.lt.s32.totalorder %s990_s0, 47 }
  0x78   : > { %s1658_s17 = scalar_lea.vmem [#allocation10], %s989_s12  ;;  %p992_p10 = scmp.ne.s32.totalorder %s1425_s10, 0 }
  0x79   : > { %s1850_s0 = smov (!%p336_p9, %s990_s0), 47  ;;  %v1448_v4 = vmov (!%p992_p10), 0.0  }
  0x7a   : > { %s991_s22 = sshll.u32 %s1850_s0, 3  ;;  %346 = sbr.rel (%p992_p10) target bundleno = 130 (0x82), region = 82  ;;  %347 = vst [vmem:[#allocation2] sm:$0xff] (!%p992_p10), %v1448_v4  ;;  %348 = vst [vmem:[#allocation2 + $0x8] sm:$0xff] (!%p992_p10), %v1448_v4 }
  0x7b   : > { %s1656_s15 = scalar_lea.vmem %s1798_s4, %s991_s22  ;;  %349 = vst [vmem:[#allocation2 + $0x10] sm:$0xff] (!%p992_p10), %v1448_v4  ;;  %350 = vst [vmem:[#allocation2 + $0x18] sm:$0xff] (!%p992_p10), %v1448_v4 }
  0x7c   : > { %351 = vst [vmem:[#allocation2 + $0x20] sm:$0xff] (!%p992_p10), %v1448_v4  ;;  %352 = vst [vmem:[#allocation2 + $0x28] sm:$0xff] (!%p992_p10), %v1448_v4 }
  0x7d   : > { %353 = vst [vmem:[#allocation2 + $0x30] sm:$0xff] (!%p992_p10), %v1448_v4  ;;  %354 = vst [vmem:[#allocation2 + $0x38] sm:$0xff] (!%p992_p10), %v1448_v4 }
  0x7e   : > { %355 = vst [vmem:[#allocation2 + $0x40] sm:$0xff] (!%p992_p10), %v1448_v4  ;;  %356 = vst [vmem:[#allocation2 + $0x48] sm:$0xff] (!%p992_p10), %v1448_v4 }
  0x7f   : > { %357 = vst [vmem:[#allocation2 + $0x50] sm:$0xff] (!%p992_p10), %v1448_v4  ;;  %358 = vst [vmem:[#allocation2 + $0x58] sm:$0xff] (!%p992_p10), %v1448_v4 }
  0x80   : > { %359 = vst [vmem:[#allocation2 + $0x60] sm:$0xff] (!%p992_p10), %v1448_v4  ;;  %360 = vst [vmem:[#allocation2 + $0x68] sm:$0xff] (!%p992_p10), %v1448_v4 }
  0x81   : > { %361 = vst [vmem:[#allocation2 + $0x70] sm:$0xff] %v1448_v4  ;;  %362 = vst [vmem:[#allocation2 + $0x78] sm:$0xff] %v1448_v4 }
  0x82 PF: > { %s363_s23 = sld [smem:[#allocation5 + %s1429_s11]] }
  0x88   : > { %p993_p13 = scmp.ge.s32.totalorder %s1425_s10, %s363_s23 }
  0x89   : > { %s380_s25 = sshra.s32 (!%p993_p13), %s1425_s10, 7  ;;  %s385_s27 = sand.u32 (!%p993_p13), 127, %s1425_s10  ;;  %v368_v5 = vld [vmem:[%s1643_s21] sm:$0xff] (!%p993_p13)  ;;  %v370_v6 = vld [vmem:[%s1643_s21 + $0x10] sm:$0xff] (!%p993_p13)  ;;  %v369_v17 = vld [vmem:[%s1643_s21 + $0x8] sm:$0xff] (!%p993_p13) }
  0x8a   : > { %367 = sbr.rel (%p993_p13) target bundleno = 410 (0x19a), region = 86  ;;  %s382_s29 = sadd.s32 (!%p993_p13), %s1429_s11, %s380_s25  ;;  %v372_v7 = vunpack.c.l.s8.bf16 (!%p993_p13), %v368_v5  ;;  %v376_v8 = vunpack.c.l.s8.bf16 (!%p993_p13), %v370_v6  ;;  %v371_v18 = vld [vmem:[%s1643_s21 + $0x18] sm:$0xff] (!%p993_p13)  ;;  %v373_v19 = vunpack.c.h.s8.bf16 (!%p993_p13), %v368_v5  ;;  %v377_v20 = vunpack.c.h.s8.bf16 (!%p993_p13), %v370_v6  ;;  %v411_v25 = vld [vmem:[#allocation2 + $0x10] sm:$0xff] (!%p993_p13)  ;;  %v409_v27 = vld [vmem:[#allocation2] sm:$0xff] (!%p993_p13) }
  0x8b   : > { %s994_s20 = sshll.u32 (!%p993_p13), %s382_s29, 7  ;;  %v374_v21 = vunpack.c.l.s8.bf16 (!%p993_p13), %v369_v17  ;;  %v378_v22 = vunpack.c.l.s8.bf16 (!%p993_p13), %v371_v18  ;;  %v375_v23 = vunpack.c.h.s8.bf16 (!%p993_p13), %v369_v17  ;;  %v379_v24 = vunpack.c.h.s8.bf16 (!%p993_p13), %v371_v18  ;;  %v419_v26 = vld [vmem:[#allocation2 + $0x50] sm:$0xff] (!%p993_p13)  ;;  %v417_v28 = vld [vmem:[#allocation2 + $0x40] sm:$0xff] (!%p993_p13)  ;;  %v412_v31 = vld [vmem:[#allocation2 + $0x18] sm:$0xff] (!%p993_p13) }
  0x8c   : > { %s386_s19 = sadd.s32 (!%p993_p13), %s994_s20, %s385_s27  ;;  %1124 = vmatprep.mubr.bf16.mxu0 (!%p993_p13), %v372_v7  ;;  %1132 = vmatprep.mubr.bf16.mxu1 (!%p993_p13), %v376_v8  ;;  %v420_v32 = vld [vmem:[#allocation2 + $0x58] sm:$0xff] (!%p993_p13)  ;;  %v410_v37 = vld [vmem:[#allocation2 + $0x8] sm:$0xff] (!%p993_p13)  ;;  %v415_v49 = vld [vmem:[#allocation2 + $0x30] sm:$0xff] (!%p993_p13) }
  0x8d   : > { %s387_s28 = sld [smem:[#allocation4 + %s386_s19]] (!%p993_p13)  ;;  %v418_v38 = vld [vmem:[#allocation2 + $0x48] sm:$0xff] (!%p993_p13)  ;;  %v423_v50 = vld [vmem:[#allocation2 + $0x70] sm:$0xff] (!%p993_p13)  ;;  %v413_v51 = vld [vmem:[#allocation2 + $0x20] sm:$0xff] (!%p993_p13) }
  0x8e   : > { %v421_v52 = vld [vmem:[#allocation2 + $0x60] sm:$0xff] (!%p993_p13)  ;;  %v416_v55 = vld [vmem:[#allocation2 + $0x38] sm:$0xff] (!%p993_p13)  ;;  %v414_v61 = vld [vmem:[#allocation2 + $0x28] sm:$0xff] (!%p993_p13) }
  0x8f   : > { %v424_v56 = vld [vmem:[#allocation2 + $0x78] sm:$0xff] (!%p993_p13)  ;;  %v422_v62 = vld [vmem:[#allocation2 + $0x68] sm:$0xff] (!%p993_p13) }
  0x93   : > { %s995_s16 = sshll.u32 %s387_s28, 7 }
  0x94   : > { %s389_s24 = sshra.s32 %s995_s16, 3 }
  0x95   : > { %s996_s0 = sshll.u32 %s389_s24, 2 }
  0x96   : > { %s1668_s12 = scalar_lea.vmem [#allocation7], %s996_s0 }
  0x97   : > { %v1263_v9 = vld [vmem:[%s1668_s12] sm:$0xff]   ;;  %v1264_v10 = vld [vmem:[%s1668_s12 + $0x8] sm:$0xff]   ;;  %v1265_v11 = vld [vmem:[%s1668_s12 + $0x10] sm:$0xff]  }
  0x98   : > { %1108 = vmatprep.subr.bf16.mxu0 %v1263_v9  ;;  %1140 = vmatprep.subr.bf16.mxu1 %v1263_v9  ;;  %v1266_v12 = vld [vmem:[%s1668_s12 + $0x18] sm:$0xff]   ;;  %v1267_v13 = vld [vmem:[%s1668_s12 + $0x20] sm:$0xff]   ;;  %v1268_v14 = vld [vmem:[%s1668_s12 + $0x28] sm:$0xff]  }
  0x99   : > { %1109 = vmatpush3.bf16.msra.mxu0 %v1263_v9  ;;  %1148 = vmatpush3.bf16.msra.mxu1 %v1263_v9  ;;  %v1269_v15 = vld [vmem:[%s1668_s12 + $0x30] sm:$0xff]   ;;  %v1270_v16 = vld [vmem:[%s1668_s12 + $0x38] sm:$0xff]  }
  0x9a   : > { %1110 = vmatprep.subr.bf16.mxu0 %v1264_v10  ;;  %1141 = vmatprep.subr.bf16.mxu1 %v1264_v10 }
  0x9d   : > { %1111 = vmatpush3.bf16.msra.mxu0 %v1264_v10  ;;  %1149 = vmatpush3.bf16.msra.mxu1 %v1264_v10 }
  0x9e   : > { %1112 = vmatprep.subr.bf16.mxu0 %v1265_v11  ;;  %1142 = vmatprep.subr.bf16.mxu1 %v1265_v11 }
  0xa1   : > { %1113 = vmatpush3.bf16.msra.mxu0 %v1265_v11  ;;  %1150 = vmatpush3.bf16.msra.mxu1 %v1265_v11 }
  0xa2   : > { %1114 = vmatprep.subr.bf16.mxu0 %v1266_v12  ;;  %1143 = vmatprep.subr.bf16.mxu1 %v1266_v12 }
  0xa5   : > { %1115 = vmatpush3.bf16.msra.mxu0 %v1266_v12  ;;  %1151 = vmatpush3.bf16.msra.mxu1 %v1266_v12 }
  0xa6   : > { %1116 = vmatprep.subr.bf16.mxu0 %v1267_v13  ;;  %1144 = vmatprep.subr.bf16.mxu1 %v1267_v13 }
  0xa9   : > { %1117 = vmatpush3.bf16.msra.mxu0 %v1267_v13  ;;  %1152 = vmatpush3.bf16.msra.mxu1 %v1267_v13 }
  0xaa   : > { %1118 = vmatprep.subr.bf16.mxu0 %v1268_v14  ;;  %1145 = vmatprep.subr.bf16.mxu1 %v1268_v14 }
  0xad   : > { %1119 = vmatpush3.bf16.msra.mxu0 %v1268_v14  ;;  %1153 = vmatpush3.bf16.msra.mxu1 %v1268_v14 }
  0xae   : > { %1120 = vmatprep.subr.bf16.mxu0 %v1269_v15  ;;  %1146 = vmatprep.subr.bf16.mxu1 %v1269_v15 }
  0xb1   : > { %1121 = vmatpush3.bf16.msra.mxu0 %v1269_v15  ;;  %1154 = vmatpush3.bf16.msra.mxu1 %v1269_v15 }
  0xb2   : > { %1122 = vmatprep.subr.bf16.mxu0 %v1270_v16  ;;  %1147 = vmatprep.subr.bf16.mxu1 %v1270_v16 }
  0xb5   : > { %1123 = vmatpush3.bf16.msra.mxu0 %v1270_v16  ;;  %1155 = vmatpush3.bf16.msra.mxu1 %v1270_v16 }
  0xb8   : > { %1125 = vmatmul.mubr.bf16.vlgmr.msra.gmra.mrb[0].mxu0 %v373_v19  ;;  %1133 = vmatmul.mubr.bf16.vlgmr.msra.gmra.mrb[0].mxu1 %v377_v20 }
  0xb9   : > { %1128 = vmatprep.mubr.bf16.mxu0 %v374_v21  ;;  %1136 = vmatprep.mubr.bf16.mxu1 %v378_v22 }
  0xc0   : > { %1129 = vmatmul.mubr.bf16.gmra.mrb[4].mxu0 %v375_v23  ;;  %1137 = vmatmul.mubr.bf16.gmra.mrb[4].mxu1 %v379_v24 }
 0x18b   : > { %v1126_v29 = vpop.f32.mrb[0].mxu0  ;;  %v1134_v30 = vpop.f32.mrb[0].mxu1 }
 0x18c   : > { %v572_v33 = vadd.f32 %v1126_v29, %v411_v25  ;;  %v580_v34 = vadd.f32 %v1134_v30, %v419_v26  ;;  %v507_v35 = vpop.f32.mrb[1].mxu0  ;;  %v539_v36 = vpop.f32.mrb[1].mxu1 }
 0x18d   : > { %v570_v39 = vadd.f32 %v507_v35, %v409_v27  ;;  %v578_v40 = vadd.f32 %v539_v36, %v417_v28  ;;  %v1127_v41 = vpop.f32.mrb[2].mxu0  ;;  %v1135_v42 = vpop.f32.mrb[2].mxu1 }
 0x18e   : > { %588 = vst [vmem:[#allocation2 + $0x10] sm:$0xff] %v572_v33  ;;  %596 = vst [vmem:[#allocation2 + $0x50] sm:$0xff] %v580_v34  ;;  %v573_v43 = vadd.f32 %v1127_v41, %v412_v31  ;;  %v581_v44 = vadd.f32 %v1135_v42, %v420_v32  ;;  %v510_v45 = vpop.f32.mrb[3].mxu0  ;;  %v542_v46 = vpop.f32.mrb[3].mxu1 }
 0x18f   : > { %586 = vst [vmem:[#allocation2] sm:$0xff] %v570_v39  ;;  %594 = vst [vmem:[#allocation2 + $0x40] sm:$0xff] %v578_v40  ;;  %v571_v47 = vadd.f32 %v510_v45, %v410_v37  ;;  %v579_v48 = vadd.f32 %v542_v46, %v418_v38 }
 0x190   : > { %589 = vst [vmem:[#allocation2 + $0x18] sm:$0xff] %v573_v43  ;;  %597 = vst [vmem:[#allocation2 + $0x58] sm:$0xff] %v581_v44 }
 0x191   : > { %587 = vst [vmem:[#allocation2 + $0x8] sm:$0xff] %v571_v47  ;;  %595 = vst [vmem:[#allocation2 + $0x48] sm:$0xff] %v579_v48 }
 0x193   : > { %v1130_v53 = vpop.f32.mrb[4].mxu0  ;;  %v1138_v54 = vpop.f32.mrb[4].mxu1 }
 0x194   : > { %v576_v57 = vadd.f32 %v1130_v53, %v415_v49  ;;  %v584_v58 = vadd.f32 %v1138_v54, %v423_v50  ;;  %v523_v59 = vpop.f32.mrb[5].mxu0  ;;  %v555_v60 = vpop.f32.mrb[5].mxu1 }
 0x195   : > { %v574_v63 = vadd.f32 %v523_v59, %v413_v51  ;;  %v582_v0 = vadd.f32 %v555_v60, %v421_v52  ;;  %v1131_v1 = vpop.f32.mrb[6].mxu0  ;;  %v1139_v2 = vpop.f32.mrb[6].mxu1 }
 0x196   : > { %592 = vst [vmem:[#allocation2 + $0x30] sm:$0xff] %v576_v57  ;;  %600 = vst [vmem:[#allocation2 + $0x70] sm:$0xff] %v584_v58  ;;  %v577_v3 = vadd.f32 %v1131_v1, %v416_v55  ;;  %v585_v4 = vadd.f32 %v1139_v2, %v424_v56  ;;  %v526_v5 = vpop.f32.mrb[7].mxu0  ;;  %v558_v6 = vpop.f32.mrb[7].mxu1 }
 0x197   : > { %590 = vst [vmem:[#allocation2 + $0x20] sm:$0xff] %v574_v63  ;;  %598 = vst [vmem:[#allocation2 + $0x60] sm:$0xff] %v582_v0  ;;  %v575_v7 = vadd.f32 %v526_v5, %v414_v61  ;;  %v583_v8 = vadd.f32 %v558_v6, %v422_v62 }
 0x198   : > { %593 = vst [vmem:[#allocation2 + $0x38] sm:$0xff] %v577_v3  ;;  %601 = vst [vmem:[#allocation2 + $0x78] sm:$0xff] %v585_v4 }
 0x199   : > { %591 = vst [vmem:[#allocation2 + $0x28] sm:$0xff] %v575_v7  ;;  %599 = vst [vmem:[#allocation2 + $0x68] sm:$0xff] %v583_v8 }
 0x19a PF: > { %p1005_p0 = scmp.ne.s32.totalorder %s1425_s10, 2 }
 0x19b   : > { %v624_v9 = vld [vmem:[%s1656_s15 + $0x10] sm:$0xff] (!%p1005_p0)  ;;  %v622_v10 = vld [vmem:[%s1656_s15] sm:$0xff] (!%p1005_p0)  ;;  %v1449_v11 = vmov (!%p1005_p0), 0   ;;  %v625_v12 = vld [vmem:[%s1656_s15 + $0x18] sm:$0xff] (!%p1005_p0) }
 0x19c   : > { %605 = sbr.rel (%p1005_p0) target bundleno = 578 (0x242), region = 90  ;;  %1272 = vset.pattern.permute.xlu1 (!%p1005_p0), %v1449_v11  ;;  %1271 = vset.pattern.permute.xlu0 (!%p1005_p0), %v1449_v11  ;;  %v623_v13 = vld [vmem:[%s1656_s15 + $0x8] sm:$0xff] (!%p1005_p0)  ;;  %v626_v15 = vld [vmem:[%s1656_s15 + $0x20] sm:$0xff] (!%p1005_p0)  ;;  %v629_v16 = vld [vmem:[%s1656_s15 + $0x38] sm:$0xff] (!%p1005_p0) }
 0x19d   : > { %650 = vperm.xlu1 (!%p1005_p0), %1272, %v624_v9   ;;  %640 = vperm.xlu0 (!%p1005_p0), %1271, %v622_v10   ;;  %v627_v14 = vld [vmem:[%s1656_s15 + $0x28] sm:$0xff] (!%p1005_p0)  ;;  %v628_v17 = vld [vmem:[%s1656_s15 + $0x30] sm:$0xff] (!%p1005_p0)  ;;  %v630_v19 = vld [vmem:[%s1656_s15 + $0x40] sm:$0xff] (!%p1005_p0) }
 0x19e   : > { %v631_v18 = vld [vmem:[%s1656_s15 + $0x48] sm:$0xff] (!%p1005_p0)  ;;  %v633_v20 = vld [vmem:[%s1656_s15 + $0x58] sm:$0xff] (!%p1005_p0)  ;;  %v632_v21 = vld [vmem:[%s1656_s15 + $0x50] sm:$0xff] (!%p1005_p0) }
 0x19f   : > { %v635_v22 = vld [vmem:[%s1656_s15 + $0x68] sm:$0xff] (!%p1005_p0)  ;;  %v634_v23 = vld [vmem:[%s1656_s15 + $0x60] sm:$0xff] (!%p1005_p0)  ;;  %v637_v24 = vld [vmem:[%s1656_s15 + $0x78] sm:$0xff] (!%p1005_p0) }
 0x1a0   : > { %v636_v25 = vld [vmem:[%s1656_s15 + $0x70] sm:$0xff] (!%p1005_p0)  ;;  %v606_v27 = vld [vmem:[#allocation2] sm:$0xff] (!%p1005_p0)  ;;  %v609_v33 = vld [vmem:[#allocation2 + $0x18] sm:$0xff] (!%p1005_p0) }
 0x1a1   : > { %655 = vperm.xlu1 (!%p1005_p0), %1272, %v625_v12   ;;  %645 = vperm.xlu0 (!%p1005_p0), %1271, %v623_v13   ;;  %v608_v26 = vld [vmem:[#allocation2 + $0x10] sm:$0xff] (!%p1005_p0)  ;;  %v1700_v30 = vld [vmem:[%s1799_s5] ss:$0 sm:$0xff] (!%p1005_p0)  ;;  %v607_v34 = vld [vmem:[#allocation2 + $0x8] sm:$0xff] (!%p1005_p0) }
 0x1a2   : > { %v611_v41 = vld [vmem:[#allocation2 + $0x28] sm:$0xff] (!%p1005_p0)  ;;  %v610_v42 = vld [vmem:[#allocation2 + $0x20] sm:$0xff] (!%p1005_p0)  ;;  %v613_v53 = vld [vmem:[#allocation2 + $0x38] sm:$0xff] (!%p1005_p0) }
 0x1a3   : > { %v612_v54 = vld [vmem:[#allocation2 + $0x30] sm:$0xff]  ;;  %v615_v1 = vld [vmem:[#allocation2 + $0x48] sm:$0xff]  ;;  %v614_v2 = vld [vmem:[#allocation2 + $0x40] sm:$0xff] }
 0x1a4   : > { %v617_v12 = vld [vmem:[#allocation2 + $0x58] sm:$0xff]  ;;  %v616_v13 = vld [vmem:[#allocation2 + $0x50] sm:$0xff] }
 0x1a5   : > { %665 = vperm.xlu1 %1272, %v627_v14   ;;  %660 = vperm.xlu0 %1271, %v626_v15  }
 0x1a9   : > { %675 = vperm.xlu1 %1272, %v629_v16   ;;  %670 = vperm.xlu0 %1271, %v628_v17  }
 0x1ad   : > { %685 = vperm.xlu1 %1272, %v631_v18   ;;  %680 = vperm.xlu0 %1271, %v630_v19  }
 0x1b1   : > { %695 = vperm.xlu1 %1272, %v633_v20   ;;  %690 = vperm.xlu0 %1271, %v632_v21  }
 0x1b5   : > { %705 = vperm.xlu1 %1272, %v635_v22   ;;  %700 = vperm.xlu0 %1271, %v634_v23   ;;  %v619_v23 = vld [vmem:[#allocation2 + $0x68] sm:$0xff] }
 0x1b9   : > { %715 = vperm.xlu1 %1272, %v637_v24   ;;  %710 = vperm.xlu0 %1271, %v636_v25   ;;  %v618_v24 = vld [vmem:[#allocation2 + $0x60] sm:$0xff] }
 0x21c   : > { %v651_v28 = vpop.permute.xlu1 %650  ;;  %v641_v29 = vpop.permute.xlu0 %640 }
 0x21d   : > { %v720_v31 = vmul.f32 %v651_v28, %v608_v26  ;;  %v718_v32 = vmul.f32 %v641_v29, %v606_v27 }
 0x21f   : > { %v743_v35 = vadd.f32 %v1700_v30, %v720_v31  ;;  %v741_v36 = vadd.f32 %v1700_v30, %v718_v32 }
 0x220   : > { %v656_v37 = vpop.permute.xlu1 %655  ;;  %v646_v38 = vpop.permute.xlu0 %645 }
 0x221   : > { %v721_v39 = vmul.f32 %v656_v37, %v609_v33  ;;  %v719_v40 = vmul.f32 %v646_v38, %v607_v34  ;;  %v759_v45 = vmax.f32 %v743_v35, 0.0  ;;  %v757_v46 = vmax.f32 %v741_v36, 0.0  ;;  %v621_v35 = vld [vmem:[#allocation2 + $0x78] sm:$0xff]  ;;  %v620_v36 = vld [vmem:[#allocation2 + $0x70] sm:$0xff] }
 0x223   : > { %v744_v43 = vadd.f32 %v1700_v30, %v721_v39  ;;  %v742_v44 = vadd.f32 %v1700_v30, %v719_v40 }
 0x224   : > { %v666_v47 = vpop.permute.xlu1 %665  ;;  %v661_v48 = vpop.permute.xlu0 %660 }
 0x225   : > { %v760_v49 = vmax.f32 %v744_v43, 0.0  ;;  %v758_v50 = vmax.f32 %v742_v44, 0.0  ;;  %v723_v51 = vmul.f32 %v666_v47, %v611_v41  ;;  %v722_v52 = vmul.f32 %v661_v48, %v610_v42 }
 0x227   : > { %v1053_v55 = vpack.c.bf16 %v760_v49, %v759_v45  ;;  %v1048_v56 = vpack.c.bf16 %v758_v50, %v757_v46  ;;  %v746_v57 = vadd.f32 %v1700_v30, %v723_v51  ;;  %v745_v58 = vadd.f32 %v1700_v30, %v722_v52 }
 0x228   : > { %v676_v59 = vpop.permute.xlu1 %675  ;;  %v671_v60 = vpop.permute.xlu0 %670 }
 0x229   : > { %1085 = vst [vmem:[%s1658_s17 + $0x8] sm:$0xff] %v1053_v55   ;;  %1049 = vst [vmem:[%s1658_s17] sm:$0xff] %v1048_v56   ;;  %v762_v61 = vmax.f32 %v746_v57, 0.0  ;;  %v761_v62 = vmax.f32 %v745_v58, 0.0  ;;  %v725_v63 = vmul.f32 %v676_v59, %v613_v53  ;;  %v724_v0 = vmul.f32 %v671_v60, %v612_v54 }
 0x22b   : > { %v1058_v3 = vpack.c.bf16 %v762_v61, %v761_v62  ;;  %v748_v4 = vadd.f32 %v1700_v30, %v725_v63  ;;  %v747_v5 = vadd.f32 %v1700_v30, %v724_v0 }
 0x22c   : > { %v686_v6 = vpop.permute.xlu1 %685  ;;  %v681_v7 = vpop.permute.xlu0 %680 }
 0x22d   : > { %1086 = vst [vmem:[%s1658_s17 + $0x10] sm:$0xff] %v1058_v3   ;;  %v764_v8 = vmax.f32 %v748_v4, 0.0  ;;  %v763_v9 = vmax.f32 %v747_v5, 0.0  ;;  %v727_v10 = vmul.f32 %v686_v6, %v615_v1  ;;  %v726_v11 = vmul.f32 %v681_v7, %v614_v2 }
 0x22f   : > { %v1063_v14 = vpack.c.bf16 %v764_v8, %v763_v9  ;;  %v750_v15 = vadd.f32 %v1700_v30, %v727_v10  ;;  %v749_v16 = vadd.f32 %v1700_v30, %v726_v11 }
 0x230   : > { %v696_v17 = vpop.permute.xlu1 %695  ;;  %v691_v18 = vpop.permute.xlu0 %690 }
 0x231   : > { %1087 = vst [vmem:[%s1658_s17 + $0x18] sm:$0xff] %v1063_v14   ;;  %v766_v19 = vmax.f32 %v750_v15, 0.0  ;;  %v765_v20 = vmax.f32 %v749_v16, 0.0  ;;  %v729_v21 = vmul.f32 %v696_v17, %v617_v12  ;;  %v728_v22 = vmul.f32 %v691_v18, %v616_v13 }
 0x233   : > { %v1068_v25 = vpack.c.bf16 %v766_v19, %v765_v20  ;;  %v752_v26 = vadd.f32 %v1700_v30, %v729_v21  ;;  %v751_v27 = vadd.f32 %v1700_v30, %v728_v22 }
 0x234   : > { %v706_v28 = vpop.permute.xlu1 %705  ;;  %v701_v29 = vpop.permute.xlu0 %700 }
 0x235   : > { %1088 = vst [vmem:[%s1658_s17 + $0x20] sm:$0xff] %v1068_v25   ;;  %v768_v31 = vmax.f32 %v752_v26, 0.0  ;;  %v767_v32 = vmax.f32 %v751_v27, 0.0  ;;  %v731_v33 = vmul.f32 %v706_v28, %v619_v23  ;;  %v730_v34 = vmul.f32 %v701_v29, %v618_v24 }
 0x237   : > { %v1073_v37 = vpack.c.bf16 %v768_v31, %v767_v32  ;;  %v754_v38 = vadd.f32 %v1700_v30, %v731_v33  ;;  %v753_v39 = vadd.f32 %v1700_v30, %v730_v34 }
 0x238   : > { %v716_v40 = vpop.permute.xlu1 %715  ;;  %v711_v41 = vpop.permute.xlu0 %710 }
 0x239   : > { %1089 = vst [vmem:[%s1658_s17 + $0x28] sm:$0xff] %v1073_v37   ;;  %v770_v42 = vmax.f32 %v754_v38, 0.0  ;;  %v769_v43 = vmax.f32 %v753_v39, 0.0  ;;  %v733_v44 = vmul.f32 %v716_v40, %v621_v35  ;;  %v732_v45 = vmul.f32 %v711_v41, %v620_v36 }
 0x23b   : > { %v1078_v46 = vpack.c.bf16 %v770_v42, %v769_v43  ;;  %v756_v47 = vadd.f32 %v1700_v30, %v733_v44  ;;  %v755_v48 = vadd.f32 %v1700_v30, %v732_v45 }
 0x23d   : > { %1090 = vst [vmem:[%s1658_s17 + $0x30] sm:$0xff] %v1078_v46   ;;  %v772_v49 = vmax.f32 %v756_v47, 0.0  ;;  %v771_v50 = vmax.f32 %v755_v48, 0.0 }
 0x23f   : > { %v1083_v51 = vpack.c.bf16 %v772_v49, %v771_v50 }
 0x241   : > { %1091 = vst [vmem:[%s1658_s17 + $0x38] sm:$0xff] %v1083_v51  }
 0x242 PF: > { %s1044_s22 = sshll.u32 %s1429_s11, 10  ;;  %s867_s23 = sshll.u32 %s1658_s17, 4  ;;  %s1733_s23 = int_to_ptr.vmem [resolvable:$true] %s867_s23 }
 0x243   : > { %s1730_s15 = scalar_lea.hbm %s1800_s6, %s1044_s22  ;;  %s1737_s25 = scalar_lea.sflag [#allocation9], %s323_s7 }
 0x244   : > { %s1325_s27 = scalar_lea.vmem %s1733_s23, 1024  ;;  %p1828_p5 = scmp.ne.s32.totalorder %s1818_s26, 0 }
 0x245   : > { %p1326_p3 = scmp.ne.s32.totalorder %s1733_s23, %s1325_s27  ;;  %s1450_s11 = smov [#allocation10]  }
 0x246   : > { %s1329_s29 = sshll.u32 %s1450_s11, 4  ;;  %s1330_s29 = int_to_ptr.vmem [resolvable:$false] %s1329_s29 }
 0x247   : > { %p1327_p6 = pnand %p1326_p3, %p1828_p5  ;;  %s1331_s20 = scalar_lea.vmem %s1330_s29, 2048 }
 0x248   : > { %p1332_p11 = scmp.lt.s32.totalorder %s1733_s23, %s1330_s29  ;;  %p1333_p12 = scmp.lt.s32.totalorder %s1331_s20, %s1325_s27 }
 0x249   : > { %p1328_p8 = pneg %p1327_p6 }
 0x24a   : > { %p1334_p2 = por %p1333_p12, %p1332_p11 }
 0x24c   : > { %p1335_p4 = pnand %p1334_p2, %p1328_p8 }
 0x24e   : > { %1338 = shalt.err (!%p1335_p4)
}
 0x24f   : > { %s1339_s7 = scalar_lea.hbm %s1730_s15, 1024  ;;  %s1343_s28 = scalar_lea.hbm %s1800_s6, 3072 }
 0x250   : > { %p1340_p1 = scmp.ne.s32.totalorder %s1730_s15, %s1339_s7  ;;  %p1344_p10 = scmp.lt.u32.totalorder %s1730_s15, %s1800_s6 }
 0x251   : > { %p1345_p13 = scmp.lt.u32.totalorder %s1343_s28, %s1339_s7  ;;  %p1347_p3 = scmp.lt.u32.totalorder %s1339_s7, %s1730_s15 }
 0x252   : > { %p1341_p7 = pnand %p1340_p1, %p1828_p5 }
 0x253   : > { %p1346_p0 = por %p1345_p13, %p1344_p10 }
 0x254   : > { %p1342_p9 = pneg %p1341_p7 }
 0x255   : > { %p1348_p6 = por %p1347_p3, %p1346_p0 }
 0x257   : > { %p1349_p8 = pnand %p1348_p6, %p1342_p9 }
 0x259   : > { %1352 = shalt.err (!%p1349_p8)
}
 0x25a   : > { %s1451_s0 = smov 64   ;;  %s1452_s12 = smov 4  }
 0x25b   : > { %1161 = dma.vmem_to_hbm [thread:$0]  (%p1828_p5), %s1733_s23, 1024, %s1730_s15, %s1737_s25, %s1451_s0, %s1451_s0, %s1452_s12  }
 0x25c PF: > { %s1829_s10 = sld [smem:[#allocation19_spill]]  ;;  %p1173_p11 = scmp.ge.s32.totalorder %s1441_s14, 2 }
 0x25d   : > { %s882_s21 = sand.u32 1, %s1405_s1  }
 0x25e   : > { %s883_s22 = scalar_lea.sflag [#allocation9], %s882_s21 }
 0x262   : > { %p1830_p12 = scmp.ne.s32.totalorder %s1829_s10, 0 }
 0x264   : > { %p1168_p2 = pnand %p1173_p11, %p1830_p12 }
 0x266   : > { %1400 = dma.done.wait (!%p1168_p2), %s883_s22, 1024  }
 0x267   : > { %1402 = vsyncadd (!%p1168_p2), %s883_s22, 4294966272  ;;  %s30_s14 = sadd.s32 1, %s1441_s14   ;;  %s1831_s18 = sld [smem:[#allocation14_spill]] }
 0x268   : > { %p27_p4 = scmp.ge.s32.totalorder %s30_s14, 11   ;;  %s1832_s7 = sld [smem:[#allocation18_spill]] }
 0x269   : > { %s1833_s26 = sld [smem:[#allocation20_spill]]  ;;  %s1834_s10 = sld [smem:[#allocation15_spill]] }
 0x26a   : > { %s1835_s12 = sld [smem:[#allocation16_spill]]  ;;  %s1836_s15 = sld [smem:[#allocation17_spill]] }
 0x26b   : > { %s1837_s1 = smov %s1409_s30  ;;  %s1839_s8 = smov %s1421_s9 }
 0x26c   : > { %s1841_s11 = smov %s1437_s13  ;;  %29 = sbr.rel (!%p27_p4) target bundleno = 32 (0x20), region = 135 }
 0x26d   : > { %s1838_s30 = smov %s1831_s18 }
 0x26f   : > { %s1840_s9 = smov %s1833_s26 }
 0x270   : > { %s1842_s13 = smov %s1836_s15 }
 0x273   :  { %888 = vsyncpa [#allocation8], 1 }
 0x274   :  { %890 = vsyncpa [#allocation8 + $0x1], 1 }
 0x275   :  { %891 = vsyncpa [#allocation9], 1 }
 0x276   :  { %893 = vsyncpa [#allocation9 + $0x1], 1 }

</bundles_post_ra>
